<compile_context>
chip_gen: v7x
topology: tpu7x:2x2x1
jax: 0.10.0
libtpu: 0.0.40
codegen_flags: <defaults>
</compile_context>

<pallas_src>
import jax
import jax.numpy as jnp
from jax import lax
from jax.experimental import pallas as pl
from jax.experimental.pallas import tpu as pltpu


def _round_up(n, m):
    return ((n + m - 1) // m) * m


def _cdiv(a, b):
    return -(-a // b)


def mlp_kernel(x_ref, w1_ref, b1_ref, w2_ref, b2_ref, w3_ref, b3_ref,
               w4t_ref, b4_ref, o_ref):
    """Fused 4-layer MLP on one (TB, 136) batch tile; weights stay VMEM-resident.

    Numerics: bf16 at every MXU input, f32 accumulation, f32 bias/ReLU.
    """
    bf = jnp.bfloat16

    # x arrives in its HBM dtype (f32 common case, single HBM pass);
    # cast to bf16 only at the MXU input.
    x = x_ref[...].astype(bf)                                          # (TB, 136)

    h = jnp.dot(x, w1_ref[...], preferred_element_type=jnp.float32) + b1_ref[...]
    h = jnp.maximum(h, 0.0)                                            # (TB, 64) f32
    # Dropout(p=0.3) -> identity in eval mode.

    h = jnp.dot(h.astype(bf), w2_ref[...],
                preferred_element_type=jnp.float32) + b2_ref[...]
    h = jnp.maximum(h, 0.0)                                            # (TB, 32) f32

    h = jnp.dot(h.astype(bf), w3_ref[...],
                preferred_element_type=jnp.float32) + b3_ref[...]
    h = jnp.maximum(h, 0.0)                                            # (TB, 32) f32

    # Final layer computed "NT"-style so the per-tile result is lane-dense:
    #   out[0, b] = sum_k w4t[0, k] * h[b, k] + b4        -> (1, TB), batch on lanes
    out_row = lax.dot_general(
        w4t_ref[...], h.astype(bf),
        dimension_numbers=(((1,), (1,)), ((), ())),
        preferred_element_type=jnp.float32) + b4_ref[...]              # (1, TB)

    o_ref[...] = out_row[None].astype(o_ref.dtype)                     # (1, 1, TB)


def _choose_tile(B, tile_b):
    """Batch tile TB and grid size. Keeps >= 2 grid steps for v7x megacore when
    B >= 32; single-tile batches use TB == B (block == array, no partial rows)."""
    tb = _round_up(min(int(tile_b), B), 16)
    if B >= 32:
        tb = min(tb, _round_up(_cdiv(B, 2), 16))   # v7x: >= 2 "parallel" steps
    n = _cdiv(B, tb)
    if n == 1:
        return B, 1
    tb = _round_up(_cdiv(B, n), 16)                # rebalance -> bound padding waste
    return tb, _cdiv(B, tb)


def regression_forward(x, params, *, tile_b=8192):
    """x: (B, C, L) with C*L == 136 (any float dtype). Returns (B,) float32."""
    B = x.shape[0]
    x2d = x.reshape(B, -1)                         # torch.nn.Flatten on (B, C, L)
    K = x2d.shape[1]
    assert K == 136, f"expected flattened dim 136, got {K}"

    w1, b1, w2, b2, w3, b3, w4, b4 = params
    # Resident weights in bf16 (layer 2-4 dots run as single bf16 MXU passes).
    w1c = w1.astype(jnp.bfloat16)
    w2c = w2.astype(jnp.bfloat16)
    w3c = w3.astype(jnp.bfloat16)
    w4tc = w4.reshape(1, w4.shape[0]).astype(jnp.bfloat16)   # (1, 32) transposed

    TB, num_tiles = _choose_tile(B, tile_b)

    weights = (w1c, b1, w2c, b2, w3c, b3, w4tc, b4)
    itemsize = int(x2d.dtype.itemsize)
    w_bytes = int(sum(int(a.size) * int(a.dtype.itemsize) for a in weights))

    # VMEM budget from the real footprint (v7x has only 64 MiB physical / TC).
    vmem_bytes = (2 * TB * K * itemsize            # streamed x double-buffer
                  + 2 * TB * 4                     # lane-dense output double-buffer
                  + 2 * w_bytes                    # resident weights / biases
                  + TB * 1536                      # (TB,64)/(TB,32) f32+bf16 temps
                  + (4 << 20))                     # fixed Mosaic scratch headroom
    vmem_limit = int(min(max(vmem_bytes, 16 << 20), 48 << 20))

    flops = 2 * (136 * 64 + 64 * 32 + 32 * 32 + 32 * 1) * B
    cost = pl.CostEstimate(flops=flops, transcendentals=0,
                           bytes_accessed=B * (K * itemsize + 4) + w_bytes)

    # Deep-buffer the streamed x only when tiles are small (short DMAs).
    if TB <= 512 and num_tiles >= 4:
        x_spec = pl.BlockSpec((TB, K), lambda i: (i, 0),
                              pipeline_mode=pl.Buffered(3))
    else:
        x_spec = pl.BlockSpec((TB, K), lambda i: (i, 0))

    def resident(a):   # whole array, constant block index -> stays in VMEM
        return pl.BlockSpec(tuple(a.shape), lambda i: (0, 0))

    out = pl.pallas_call(
        mlp_kernel,
        out_shape=jax.ShapeDtypeStruct((num_tiles, 1, TB), jnp.float32),
        grid=(num_tiles,),
        in_specs=[
            x_spec,                                # streamed batch tiles
            resident(w1c), resident(b1),
            resident(w2c), resident(b2),
            resident(w3c), resident(b3),
            resident(w4tc), resident(b4),
        ],
        out_specs=pl.BlockSpec((1, 1, TB), lambda i: (i, 0, 0)),   # lane-dense
        compiler_params=pltpu.CompilerParams(
            dimension_semantics=("parallel",),     # megacore sharding on v7x
            vmem_limit_bytes=vmem_limit),
        cost_estimate=cost,
    )(x2d, w1c, b1, w2c, b2, w3c, b3, w4tc, b4)

    # squeeze(1) + drop the (unspecified) tail rows of a partial last block.
    return out.reshape(-1)[:B]


def init_params(key):
    """nn.Linear-style init U(-1/sqrt(fan_in), +1/sqrt(fan_in)).
    Weights stored as (in_features, out_features); biases as (1, out_features)."""
    dims = [(136, 64), (64, 32), (32, 32), (32, 1)]
    params = []
    for (fan_in, fan_out) in dims:
        key, kw, kb = jax.random.split(key, 3)
        bound = 1.0 / (fan_in ** 0.5)
        w = jax.random.uniform(kw, (fan_in, fan_out), jnp.float32, -bound, bound)
        b = jax.random.uniform(kb, (1, fan_out), jnp.float32, -bound, bound)
        params.extend([w, b])
    return tuple(params)


if __name__ == "__main__":
    key = jax.random.PRNGKey(0)
    kx, kx2, kp = jax.random.split(key, 3)

    params = init_params(kp)
    w1, b1, w2, b2, w3, b3, w4, b4 = params

    def reference(xin):
        # Mirrors the kernel numerics: bf16 at every dot input, f32 accumulation,
        # f32 bias/ReLU.
        bf = jnp.bfloat16
        bn = xin.shape[0]
        h = xin.reshape(bn, -1).astype(bf)
        h = jnp.maximum(jnp.dot(h, w1.astype(bf),
                                preferred_element_type=jnp.float32) + b1, 0.0)
        h = jnp.maximum(jnp.dot(h.astype(bf), w2.astype(bf),
                                preferred_element_type=jnp.float32) + b2, 0.0)
        h = jnp.maximum(jnp.dot(h.astype(bf), w3.astype(bf),
                                preferred_element_type=jnp.float32) + b3, 0.0)
        out = jnp.dot(h.astype(bf), w4.astype(bf),
                      preferred_element_type=jnp.float32) + b4
        return out[:, 0]

    # Test 1: tiny batch (B=2, C=4, L=34) -> flattened 136; single full block.
    x = jax.random.normal(kx, (2, 4, 34), jnp.float32)
    out = regression_forward(x, params)
    jax.block_until_ready(out)
    assert out.shape == (2,), out.shape
    assert jnp.allclose(out, reference(x), atol=2e-3, rtol=2e-3)

    # Test 2: multi-tile grid with a ragged tail (B=300 -> 2 tiles of 160,
    # last block partial; tail rows discarded by [:B]).
    x2 = jax.random.normal(kx2, (300, 4, 34), jnp.float32)
    out2 = regression_forward(x2, params)
    jax.block_until_ready(out2)
    assert out2.shape == (300,), out2.shape
    assert jnp.allclose(out2, reference(x2), atol=2e-3, rtol=2e-3)

    # Test 3: small tiles (B=300, TB=64 -> 5 steps) exercises the
    # pl.Buffered(3) deep-buffer path on the streamed x.
    out3 = regression_forward(x2, params, tile_b=64)
    jax.block_until_ready(out3)
    assert out3.shape == (300,), out3.shape
    assert jnp.allclose(out3, reference(x2), atol=2e-3, rtol=2e-3)

    print("KERNEL_OK")
</pallas_src>

<mosaic_0001>
module attributes {stable_mosaic.version = 11 : i64} {
  func.func @mlp_kernel(%arg0: i32, %arg1: memref<2x136xf32, #tpu.memory_space<vmem>>, %arg2: memref<136x64xbf16, #tpu.memory_space<vmem>>, %arg3: memref<1x64xf32, #tpu.memory_space<vmem>>, %arg4: memref<64x32xbf16, #tpu.memory_space<vmem>>, %arg5: memref<1x32xf32, #tpu.memory_space<vmem>>, %arg6: memref<32x32xbf16, #tpu.memory_space<vmem>>, %arg7: memref<1x32xf32, #tpu.memory_space<vmem>>, %arg8: memref<1x32xbf16, #tpu.memory_space<vmem>>, %arg9: memref<1x1xf32, #tpu.memory_space<vmem>>, %arg10: memref<1x1x2xf32, #tpu.memory_space<vmem>>) attributes {dimension_semantics = [#tpu.dimension_semantics<parallel>], iteration_bounds = array<i64: 1>, scalar_prefetch = 0 : i64, scratch_operands = 0 : i64, tpu.core_type = #tpu.core_type<tc>, window_params = [{transform_indices = @transform_0, window_bounds = array<i64: 2, 136>}, {pipeline_mode = #tpu.pipeline_mode<synchronous>, transform_indices = @transform_1, window_bounds = array<i64: 136, 64>}, {pipeline_mode = #tpu.pipeline_mode<synchronous>, transform_indices = @transform_2, window_bounds = array<i64: 1, 64>}, {pipeline_mode = #tpu.pipeline_mode<synchronous>, transform_indices = @transform_3, window_bounds = array<i64: 64, 32>}, {pipeline_mode = #tpu.pipeline_mode<synchronous>, transform_indices = @transform_4, window_bounds = array<i64: 1, 32>}, {pipeline_mode = #tpu.pipeline_mode<synchronous>, transform_indices = @transform_5, window_bounds = array<i64: 32, 32>}, {pipeline_mode = #tpu.pipeline_mode<synchronous>, transform_indices = @transform_6, window_bounds = array<i64: 1, 32>}, {pipeline_mode = #tpu.pipeline_mode<synchronous>, transform_indices = @transform_7, window_bounds = array<i64: 1, 32>}, {pipeline_mode = #tpu.pipeline_mode<synchronous>, transform_indices = @transform_8, window_bounds = array<i64: 1, 1>}, {transform_indices = @transform_9, window_bounds = array<i64: 1, 1, 2>}]} {
    %c0 = arith.constant 0 : index
    %c0_0 = arith.constant 0 : index
    %0 = vector.load %arg1[%c0, %c0_0] : memref<2x136xf32, #tpu.memory_space<vmem>>, vector<2x136xf32>
    %1 = arith.truncf %0 : vector<2x136xf32> to vector<2x136xbf16>
    %c0_1 = arith.constant 0 : index
    %c0_2 = arith.constant 0 : index
    %2 = vector.load %arg2[%c0_1, %c0_2] : memref<136x64xbf16, #tpu.memory_space<vmem>>, vector<136x64xbf16>
    %cst = arith.constant dense<0.000000e+00> : vector<2x64xf32>
    %3 = tpu.matmul %1, %2, %cst {dimension_numbers = #tpu.dot_dimension_numbers<[1], [0], [0], [1], [0, 0, 1, 1], [], []>} : vector<2x136xbf16>, vector<136x64xbf16>, vector<2x64xf32> -> vector<2x64xf32>
    %c0_3 = arith.constant 0 : index
    %c0_4 = arith.constant 0 : index
    %4 = vector.load %arg3[%c0_3, %c0_4] : memref<1x64xf32, #tpu.memory_space<vmem>>, vector<1x64xf32>
    %5 = vector.broadcast %4 : vector<1x64xf32> to vector<2x64xf32>
    %6 = arith.addf %3, %5 : vector<2x64xf32>
    %cst_5 = arith.constant 0.000000e+00 : f32
    %7 = vector.broadcast %cst_5 : f32 to vector<2x64xf32>
    %8 = arith.maximumf %6, %7 : vector<2x64xf32>
    %9 = arith.truncf %8 : vector<2x64xf32> to vector<2x64xbf16>
    %c0_6 = arith.constant 0 : index
    %c0_7 = arith.constant 0 : index
    %10 = vector.load %arg4[%c0_6, %c0_7] : memref<64x32xbf16, #tpu.memory_space<vmem>>, vector<64x32xbf16>
    %cst_8 = arith.constant dense<0.000000e+00> : vector<2x32xf32>
    %11 = tpu.matmul %9, %10, %cst_8 {dimension_numbers = #tpu.dot_dimension_numbers<[1], [0], [0], [1], [0, 0, 1, 1], [], []>} : vector<2x64xbf16>, vector<64x32xbf16>, vector<2x32xf32> -> vector<2x32xf32>
    %c0_9 = arith.constant 0 : index
    %c0_10 = arith.constant 0 : index
    %12 = vector.load %arg5[%c0_9, %c0_10] : memref<1x32xf32, #tpu.memory_space<vmem>>, vector<1x32xf32>
    %13 = vector.broadcast %12 : vector<1x32xf32> to vector<2x32xf32>
    %14 = arith.addf %11, %13 : vector<2x32xf32>
    %cst_11 = arith.constant 0.000000e+00 : f32
    %15 = vector.broadcast %cst_11 : f32 to vector<2x32xf32>
    %16 = arith.maximumf %14, %15 : vector<2x32xf32>
    %17 = arith.truncf %16 : vector<2x32xf32> to vector<2x32xbf16>
    %c0_12 = arith.constant 0 : index
    %c0_13 = arith.constant 0 : index
    %18 = vector.load %arg6[%c0_12, %c0_13] : memref<32x32xbf16, #tpu.memory_space<vmem>>, vector<32x32xbf16>
    %cst_14 = arith.constant dense<0.000000e+00> : vector<2x32xf32>
    %19 = tpu.matmul %17, %18, %cst_14 {dimension_numbers = #tpu.dot_dimension_numbers<[1], [0], [0], [1], [0, 0, 1, 1], [], []>} : vector<2x32xbf16>, vector<32x32xbf16>, vector<2x32xf32> -> vector<2x32xf32>
    %c0_15 = arith.constant 0 : index
    %c0_16 = arith.constant 0 : index
    %20 = vector.load %arg7[%c0_15, %c0_16] : memref<1x32xf32, #tpu.memory_space<vmem>>, vector<1x32xf32>
    %21 = vector.broadcast %20 : vector<1x32xf32> to vector<2x32xf32>
    %22 = arith.addf %19, %21 : vector<2x32xf32>
    %cst_17 = arith.constant 0.000000e+00 : f32
    %23 = vector.broadcast %cst_17 : f32 to vector<2x32xf32>
    %24 = arith.maximumf %22, %23 : vector<2x32xf32>
    %c0_18 = arith.constant 0 : index
    %c0_19 = arith.constant 0 : index
    %25 = vector.load %arg8[%c0_18, %c0_19] : memref<1x32xbf16, #tpu.memory_space<vmem>>, vector<1x32xbf16>
    %26 = arith.truncf %24 : vector<2x32xf32> to vector<2x32xbf16>
    %cst_20 = arith.constant dense<0.000000e+00> : vector<1x2xf32>
    %27 = tpu.matmul %25, %26, %cst_20 {dimension_numbers = #tpu.dot_dimension_numbers<[1], [1], [0], [0], [0, 0, 1, 0], [], []>} : vector<1x32xbf16>, vector<2x32xbf16>, vector<1x2xf32> -> vector<1x2xf32>
    %c0_21 = arith.constant 0 : index
    %c0_22 = arith.constant 0 : index
    %28 = vector.load %arg9[%c0_21, %c0_22] : memref<1x1xf32, #tpu.memory_space<vmem>>, vector<1x1xf32>
    %29 = vector.broadcast %28 : vector<1x1xf32> to vector<1x2xf32>
    %30 = arith.addf %27, %29 : vector<1x2xf32>
    %31 = vector.shape_cast %30 : vector<1x2xf32> to vector<1x1x2xf32>
    %c0_23 = arith.constant 0 : index
    %c0_24 = arith.constant 0 : index
    %c0_25 = arith.constant 0 : index
    %32 = vector.load %arg10[%c0_23, %c0_24, %c0_25] : memref<1x1x2xf32, #tpu.memory_space<vmem>>, vector<1x1x2xf32>
    tpu.vector_store %arg10[%c0_23, %c0_24, %c0_25], %31 {strides = array<i32>} : memref<1x1x2xf32, #tpu.memory_space<vmem>>, vector<1x1x2xf32>,
    return
  }
  func.func @transform_0(%arg0: i32) -> (i32, i32) {
    %c0_i32 = arith.constant 0 : i32
    %c0_i32_0 = arith.constant 0 : i32
    return %arg0, %c0_i32 : i32, i32
  }
  func.func @transform_1(%arg0: i32) -> (i32, i32) {
    %c0_i32 = arith.constant 0 : i32
    %c0_i32_0 = arith.constant 0 : i32
    %c0_i32_1 = arith.constant 0 : i32
    return %c0_i32, %c0_i32_0 : i32, i32
  }
  func.func @transform_2(%arg0: i32) -> (i32, i32) {
    %c0_i32 = arith.constant 0 : i32
    %c0_i32_0 = arith.constant 0 : i32
    %c0_i32_1 = arith.constant 0 : i32
    return %c0_i32, %c0_i32_0 : i32, i32
  }
  func.func @transform_3(%arg0: i32) -> (i32, i32) {
    %c0_i32 = arith.constant 0 : i32
    %c0_i32_0 = arith.constant 0 : i32
    %c0_i32_1 = arith.constant 0 : i32
    return %c0_i32, %c0_i32_0 : i32, i32
  }
  func.func @transform_4(%arg0: i32) -> (i32, i32) {
    %c0_i32 = arith.constant 0 : i32
    %c0_i32_0 = arith.constant 0 : i32
    %c0_i32_1 = arith.constant 0 : i32
    return %c0_i32, %c0_i32_0 : i32, i32
  }
  func.func @transform_5(%arg0: i32) -> (i32, i32) {
    %c0_i32 = arith.constant 0 : i32
    %c0_i32_0 = arith.constant 0 : i32
    %c0_i32_1 = arith.constant 0 : i32
    return %c0_i32, %c0_i32_0 : i32, i32
  }
  func.func @transform_6(%arg0: i32) -> (i32, i32) {
    %c0_i32 = arith.constant 0 : i32
    %c0_i32_0 = arith.constant 0 : i32
    %c0_i32_1 = arith.constant 0 : i32
    return %c0_i32, %c0_i32_0 : i32, i32
  }
  func.func @transform_7(%arg0: i32) -> (i32, i32) {
    %c0_i32 = arith.constant 0 : i32
    %c0_i32_0 = arith.constant 0 : i32
    %c0_i32_1 = arith.constant 0 : i32
    return %c0_i32, %c0_i32_0 : i32, i32
  }
  func.func @transform_8(%arg0: i32) -> (i32, i32) {
    %c0_i32 = arith.constant 0 : i32
    %c0_i32_0 = arith.constant 0 : i32
    %c0_i32_1 = arith.constant 0 : i32
    return %c0_i32, %c0_i32_0 : i32, i32
  }
  func.func @transform_9(%arg0: i32) -> (i32, i32, i32) {
    %c0_i32 = arith.constant 0 : i32
    %c0_i32_0 = arith.constant 0 : i32
    %c0_i32_1 = arith.constant 0 : i32
    return %arg0, %c0_i32, %c0_i32_0 : i32, i32, i32
  }
}

</mosaic_0001>

<bundles_post_ra>
// kernel: tpu_custom_call.1
= control target key start
LH: loop header
LB: loop body
LE: loop exit
PB: predicated region body
PF: predicated region fallthrough
CT: control target
= control target key end

     0   :  { %s650_s0 = inlined_call_operand.vmem [shape: f32[2,136], index: 0, kind: input, shape index: {}]   ;;  %s651_s1 = inlined_call_operand.vmem [shape: bf16[136,64], index: 1, kind: input, shape index: {}]   ;;  %s652_s2 = inlined_call_operand.vmem [shape: f32[1,64], index: 2, kind: input, shape index: {}]   ;;  %s653_s3 = inlined_call_operand.vmem [shape: bf16[64,32], index: 3, kind: input, shape index: {}]   ;;  %s654_s4 = inlined_call_operand.vmem [shape: f32[1,32], index: 4, kind: input, shape index: {}]   ;;  %s655_s5 = inlined_call_operand.vmem [shape: bf16[32,32], index: 5, kind: input, shape index: {}]   ;;  %s656_s6 = inlined_call_operand.vmem [shape: f32[1,32], index: 6, kind: input, shape index: {}]   ;;  %s657_s7 = inlined_call_operand.vmem [shape: bf16[1,32], index: 7, kind: input, shape index: {}]   ;;  %s658_s8 = inlined_call_operand.<no memory space> [shape: f32[1,1], index: 8, kind: input, shape index: {}]   ;;  %s659_s9 = inlined_call_operand.hbm [shape: f32[1,1,2], index: 9, kind: output, shape index: {}]  }
   0x1   :  { %v14_v0 = vstv %s658_s8 }
   0x2   :  { %15 = vst [vmem:[#allocation2] sm:$0x1] %v14_v0 }
   0x3   :  { %v466_v1 = vld [vmem:[%s651_s1] sm:$0xff]   ;;  %v505_v2 = vmov 0   ;;  %v467_v3 = vld [vmem:[%s651_s1 + $0x8] sm:$0xff]   ;;  %v506_v4 = vmov 0.0   ;;  %v468_v5 = vld [vmem:[%s651_s1 + $0x10] sm:$0xff]   ;;  %vm125_vm0 = vcmask 64512  }
   0x4   :  { %133 = vmatprep.subr.bf16.mxu0 %v505_v2  ;;  %465 = vset.pattern.permute.xlu0 %v505_v2  ;;  %v469_v6 = vld [vmem:[%s651_s1 + $0x18] sm:$0xff]   ;;  %v402_v7 = vld.sshfl [vmem:[%s650_s0] sm:$0x33 pattern:$0x76325410]  ;;  %v476_v10 = vld [vmem:[%s653_s3 + $0x8] sm:$0xff]  }
   0x5   :  { %134 = vmatpush1.bf16.msra.mxu0 %v466_v1  ;;  %435 = vmatprep.subr.bf16.mxu1 %v506_v4  ;;  %v45_v8 = vcombine.high %v402_v7, %v402_v7  ;;  %v475_v9 = vld [vmem:[%s653_s3] sm:$0xff]  }
   0x6   :  { %135 = vmatprep.subr.bf16.mxu0 %v505_v2  ;;  %436 = vmatpush3.bf16.msra.mxu1 %v475_v9  ;;  %v470_v12 = vld [vmem:[%s651_s1 + $0x20] sm:$0xff]  }
   0x7   :  { %v49_v11 = vpack.c.bf16 %v45_v8, %v45_v8  ;;  %437 = vmatprep.subr.bf16.mxu1 %v506_v4 }
   0x9   :  { %136 = vmatpush1.bf16.msra.mxu0 %v467_v3  ;;  %413 = vmatprep.mubr.msk.bf16.mxu0 %vm125_vm0, %v49_v11 }
   0xa   :  { %137 = vmatprep.subr.bf16.mxu0 %v505_v2 }
   0xd   :  { %138 = vmatpush1.bf16.msra.mxu0 %v468_v5 }
   0xe   :  { %139 = vmatprep.subr.bf16.mxu0 %v505_v2 }
  0x11   :  { %140 = vmatpush1.bf16.msra.mxu0 %v469_v6 }
  0x12   :  { %16 = vsyncpa [#allocation4], 0  ;;  %141 = vmatprep.subr.bf16.mxu0 %v505_v2  ;;  %438 = vmatpush3.bf16.msra.mxu1 %v476_v10  ;;  %v471_v13 = vld [vmem:[%s651_s1 + $0x28] sm:$0xff]   ;;  %v472_v14 = vld [vmem:[%s651_s1 + $0x30] sm:$0xff]   ;;  %vm129_vm1 = vcmask 1043456   ;;  %v48_v18 = vpack.c.bf16 %v402_v7, %v402_v7  ;;  %vm507_vm2 = vmmov 0   ;;  %v336_v50 = vlaneseq }
  0x13   :  { %439 = vmatprep.subr.bf16.mxu1 %v506_v4  ;;  %v473_v15 = vld [vmem:[%s651_s1 + $0x38] sm:$0xff]   ;;  %v474_v16 = vld [vmem:[%s651_s1 + $0x40] ss:$0 sps:$4 sm:$0xff]   ;;  %v477_v19 = vld [vmem:[%s653_s3 + $0x10] sm:$0xff]   ;;  %443 = vmatprep.mubr.msk.bf16.mxu1 %vm507_vm2, %v506_v4  ;;  %vm214_vm3 = vcmask 523264   ;;  %vm283_vm4 = vcmask 261120  }
  0x14   :  { %v131_v17 = vsel %vm129_vm1, %v474_v16, 0  ;;  %v478_v20 = vld [vmem:[%s653_s3 + $0x18] sm:$0xff]   ;;  %v403_v21 = vld [vmem:[%s652_s2] ss:$0 sm:$0xff]  ;;  %v480_v30 = vld [vmem:[%s655_s5 + $0x8] sm:$0xff]   ;;  %v337_v51 = vshrl.u32 %v336_v50, 7 }
  0x15   :  { %142 = vmatpush1.bf16.msra.mxu0 %v470_v12  ;;  %v479_v29 = vld [vmem:[%s655_s5] sm:$0xff]   ;;  %vm386_vm5 = vcmask 8192  }
  0x16   :  { %143 = vmatprep.subr.bf16.mxu0 %v505_v2  ;;  %440 = vmatpush3.bf16.msra.mxu1 %v477_v19  ;;  %v414_v31 = vld [vmem:[%s654_s4] ss:$0 sm:$0xff]  ;;  %v338_v52 = vsub.s32 0, %v337_v51 }
  0x17   :  { %441 = vmatprep.subr.bf16.mxu1 %v506_v4  ;;  %v330_v39 = vld [vmem:[#allocation2] sm:$0x1] }
  0x18   :  { %333 = vperm.xlu0 %465, %v330_v39   ;;  %v420_v40 = vld [vmem:[%s656_s6] ss:$0 sm:$0xff]  ;;  %s508_s6 = smov [#allocation3]  }
  0x19   :  { %144 = vmatpush1.bf16.msra.mxu0 %v471_v13  ;;  %v328_v49 = vld [vmem:[%s657_s7] sm:$0x1]  ;;  %s394_s22 = sshll.u32 %s508_s6, 4  ;;  %s395_s22 = int_to_ptr.vmem [resolvable:$true] %s394_s22 }
  0x1a   :  { %145 = vmatprep.subr.bf16.mxu0 %v505_v2  ;;  %442 = vmatpush3.bf16.msra.mxu1 %v478_v20  ;;  %s481_s23 = scalar_lea.vmem %s395_s22, 16  ;;  %s485_s7 = scalar_lea.vmem %s395_s22, 32 }
  0x1b   :  { %447 = vmatprep.subr.bf16.mxu1 %v506_v4  ;;  %p482_p0 = scmp.ne.s32.totalorder %s395_s22, %s481_s23  ;;  %p486_p1 = scmp.lt.s32.totalorder %s395_s22, %s395_s22 }
  0x1c   :  { %p487_p2 = scmp.lt.s32.totalorder %s485_s7, %s481_s23 }
  0x1d   :  { %146 = vmatpush1.bf16.msra.mxu0 %v472_v14 }
  0x1e   :  { %147 = vmatprep.subr.bf16.mxu0 %v505_v2  ;;  %p488_p3 = por %p487_p2, %p486_p1 }
  0x20   :  { %p489_p4 = pnand %p488_p3, %p482_p0 }
  0x21   :  { %148 = vmatpush1.bf16.msra.mxu0 %v473_v15 }
  0x22   :  { %149 = vmatprep.subr.bf16.mxu0 %v505_v2 }
  0x25   :  { %150 = vmatpush1.bf16.msra.mxu0 %v131_v17 }
  0x28   :  { %166 = vmatmul.mubr.bf16.vlgmr.msra.gmra.mrb[0].mxu0 %v48_v18 }
  0x97   :  { %v334_v53 = vpop.permute.xlu0 %333 }
  0x98   :  { %v339_v54 = vrot.slane %v334_v53, %v338_v52 }
  0xfb   :  { %v167_v22 = vpop.f32.mrb[0].mxu0 }
  0xfc   :  { %v168_v23 = vadd.f32 %v403_v21, %v167_v22  ;;  %v169_v24 = vpop.f32.mrb[1].mxu0 }
  0xfd   :  { %v170_v25 = vpop.f32.mrb[2].mxu0 }
  0xfe   :  { %v173_v26 = vmax.f32 %v168_v23, 0.0  ;;  %v171_v27 = vpop.f32.mrb[3].mxu0 }
 0x100   :  { %v174_v28 = vpack.c.bf16 %v173_v26, %v173_v26 }
 0x102   :  { %444 = vmatmul.mubr.msk.bf16.vlgmr.msra.gmra.mrb[0].mxu1 %vm214_vm3, %v174_v28 }
 0x103   :  { %451 = vmatprep.mubr.msk.bf16.mxu1 %vm507_vm2, %v506_v4  ;;  %448 = vmatpush3.bf16.msra.mxu1 %v479_v29 }
 0x104   :  { %449 = vmatprep.subr.bf16.mxu1 %v506_v4 }
 0x107   :  { %450 = vmatpush3.bf16.msra.mxu1 %v480_v30 }
 0x108   :  { %455 = vmatprep.subr.bf16.mxu1 %v506_v4 }
 0x1d5   :  { %v252_v32 = vpop.f32.mrb[0].mxu1 }
 0x1d6   :  { %v253_v33 = vadd.f32 %v414_v31, %v252_v32  ;;  %v445_v34 = vpop.f32.mrb[1].mxu1 }
 0x1d7   :  { %v255_v35 = vpop.f32.mrb[2].mxu1 }
 0x1d8   :  { %v258_v36 = vmax.f32 %v253_v33, 0.0  ;;  %v446_v37 = vpop.f32.mrb[3].mxu1 }
 0x1da   :  { %v259_v38 = vpack.c.bf16 %v258_v36, %v258_v36 }
 0x1dc   :  { %452 = vmatmul.mubr.msk.bf16.vlgmr.msra.gmra.mrb[4].mxu1 %vm283_vm4, %v259_v38 }
 0x1dd   :  { %457 = vmatprep.mubr.msk.bf16.mxu1 %vm507_vm2, %v506_v4 }
 0x2af   :  { %v321_v41 = vpop.f32.mrb[4].mxu1 }
 0x2b0   :  { %v322_v42 = vadd.f32 %v420_v40, %v321_v41  ;;  %v453_v43 = vpop.f32.mrb[5].mxu1 }
 0x2b1   :  { %v324_v44 = vpop.f32.mrb[6].mxu1 }
 0x2b2   :  { %v327_v45 = vmax.f32 %v322_v42, 0.0  ;;  %v454_v46 = vpop.f32.mrb[7].mxu1 }
 0x2b4   :  { %v329_v47 = vpack.c.bf16 %v327_v45, %v327_v45 }
 0x2b6   :  { %v344_v48 = vsel %vm283_vm4, %v329_v47, 0 }
 0x2b7   :  { %456 = vmatpush3.bf16.xpose.msra.mxu1 %v344_v48 }
 0x2be   :  { %458 = vmatmul.mubr.msk.bf16.vlgmr.msra.gmra.mrb[8].mxu1 %vm283_vm4, %v328_v49 }
 0x391   :  { %v380_v55 = vpop.f32.mrb[8].mxu1 }
 0x392   :  { %v381_v56 = vadd.f32 %v380_v55, %v339_v54  ;;  %v459_v57 = vpop.f32.mrb[9].mxu1 }
 0x393   :  { %v383_v58 = vpop.f32.mrb[10].mxu1 }
 0x394   :  { %v460_v59 = vpop.f32.mrb[11].mxu1  ;;  %387 = vst.msk [vmem:[#allocation3] sm:$0x1] %vm386_vm5, %v381_v56 }
 0x395   :  { %492 = shalt.err (!%p489_p4)
}
 0x396   :  { %s493_s0 = scalar_lea.hbm %s659_s9, 16 }
 0x397   :  { %p494_p5 = scmp.ne.s32.totalorder %s659_s9, %s493_s0  ;;  %p497_p6 = scmp.lt.u32.totalorder %s493_s0, %s659_s9 }
 0x399   :  { %p499_p7 = pnand %p497_p6, %p494_p5 }
 0x39b   :  { %502 = shalt.err (!%p499_p7)
}
 0x39c   :  { %397 = dma.vmem_to_hbm [thread:$0]  %s395_s22, 16, %s659_s9, [#allocation4]  }
 0x39d   :  { %503 = dma.done.wait [#allocation4], 16  }
 0x39e   :  { %504 = vsyncadd [#allocation4], 4294967280 }
 0x39f   :  { %401 = vsyncpa [#allocation4], 1 }

</bundles_post_ra>
